<compile_context>
chip_gen: v6e
topology: v6e:2x2x1
jax: 0.10.0
libtpu: 0.0.40
codegen_flags: <defaults>
</compile_context>

<pallas_src>
import functools
import numpy as np
import jax
import jax.numpy as jnp
from jax.experimental import pallas as pl
from jax.experimental.pallas import tpu as pltpu


def _scale_kernel(x_ref, o_ref, *, scale):
    # Whole-block copy with scaling; block is already exactly the slice.
    o_ref[...] = (x_ref[...] * scale).astype(o_ref.dtype)


def _slice_scale_kernel(x_ref, o_ref, *, scale, width):
    # Fallback: full row was DMA'd; take the static prefix, then scale.
    x = x_ref[...]                       # (b_blk, 1, row_in)
    o_ref[...] = (x[:, :, :width] * scale).astype(o_ref.dtype)


def _scaled_row_slice(x_rows, row_out, scale):
    """x_rows: (batch, row_in). Returns scale * x_rows[:, :row_out] via Pallas."""
    batch, row_in = x_rows.shape
    row_out = min(row_out, row_in)

    # (batch, 1, row) view -> block's last two dims are (1, row): the sublane
    # dim equals the full array dim and the lane dim is either full or a
    # multiple of 128, so the (8, 128) tiling constraint is always satisfied.
    x3 = x_rows.reshape(batch, 1, row_in)

    # Batch blocking: >= 2 parallel grid steps when batch >= 2 (v7x dual TC),
    # otherwise a single big block; never more than ~2 steps of pipeline
    # overhead at these shapes.
    b_blk = max(1, batch // 2) if batch >= 2 else 1
    grid = (pl.cdiv(batch, b_blk),)

    out_shape = jax.ShapeDtypeStruct((batch, 1, row_out), x_rows.dtype)
    out_spec = pl.BlockSpec((b_blk, 1, row_out), lambda b: (b, 0, 0))

    if row_out == row_in or row_out % 128 == 0:
        # Slice via BlockSpec: only the first row_out lanes of each row are
        # DMA'd; loads and stores are unmasked full-lane ops.
        kernel = functools.partial(_scale_kernel, scale=scale)
        in_spec = pl.BlockSpec((b_blk, 1, row_out), lambda b: (b, 0, 0))
    else:
        # Slice width not lane-aligned: DMA the full row, slice in-kernel.
        kernel = functools.partial(_slice_scale_kernel, scale=scale,
                                   width=row_out)
        in_spec = pl.BlockSpec((b_blk, 1, row_in), lambda b: (b, 0, 0))

    out3 = pl.pallas_call(
        kernel,
        out_shape=out_shape,
        grid=grid,
        in_specs=[in_spec],
        out_specs=out_spec,
        compiler_params=pltpu.CompilerParams(
            dimension_semantics=("parallel",)),
    )(x3)
    return out3.reshape(batch, row_out)


def first_channel_forward(x, cout, scale=1.0):
    """Pallas implementation of FirstChannel(cout, scale).forward(x)."""
    xdim = x.ndim
    if xdim == 4:
        B, C, H, W = x.shape
        co = min(cout, C)
        # Channel-major flatten: x[:, :co] is a contiguous prefix of each row.
        rows = x.reshape(B, C * H * W)
        out = _scaled_row_slice(rows, co * H * W, scale)
        return out.reshape(B, co, H, W)
    elif xdim == 2:
        B, C = x.shape
        co = min(cout, C)
        return _scaled_row_slice(x, co, scale)
    elif xdim == 3:
        # Module semantics for 3-D input: scale only, no channel slice.
        B, S, D = x.shape
        rows = x.reshape(B, S * D)
        out = _scaled_row_slice(rows, S * D, scale)
        return out.reshape(B, S, D)
    else:
        raise ValueError(f"FirstChannel: unsupported rank {xdim}")


if __name__ == "__main__":
    key = jax.random.PRNGKey(0)
    k4, k2, k3 = jax.random.split(key, 3)

    cout, scale = 2, 0.5

    # 4-D path: (batch, channels, H, W) -- the primary case.
    x4 = jax.random.normal(k4, (2, 4, 16, 16), jnp.float32)
    y4 = first_channel_forward(x4, cout, scale)
    jax.block_until_ready(y4)
    ref4 = scale * x4[:, :cout, :, :]
    np.testing.assert_allclose(np.asarray(y4), np.asarray(ref4),
                               rtol=1e-6, atol=1e-6)

    # 2-D path: (batch, features).
    x2 = jax.random.normal(k2, (2, 32), jnp.float32)
    y2 = first_channel_forward(x2, cout, scale)
    jax.block_until_ready(y2)
    ref2 = scale * x2[:, :cout]
    np.testing.assert_allclose(np.asarray(y2), np.asarray(ref2),
                               rtol=1e-6, atol=1e-6)

    # 3-D path: (batch, seq, hidden) -- module only scales here.
    x3 = jax.random.normal(k3, (2, 8, 32), jnp.float32)
    y3 = first_channel_forward(x3, cout, scale)
    jax.block_until_ready(y3)
    ref3 = scale * x3
    np.testing.assert_allclose(np.asarray(y3), np.asarray(ref3),
                               rtol=1e-6, atol=1e-6)

    print("KERNEL_OK")
</pallas_src>

<mosaic_0001>
module attributes {stable_mosaic.version = 11 : i64} {
  func.func @_scale_kernel(%arg0: i32, %arg1: memref<1x1x512xf32, #tpu.memory_space<vmem>>, %arg2: memref<1x1x512xf32, #tpu.memory_space<vmem>>) attributes {dimension_semantics = [#tpu.dimension_semantics<parallel>], iteration_bounds = array<i64: 2>, scalar_prefetch = 0 : i64, scratch_operands = 0 : i64, tpu.core_type = #tpu.core_type<tc>, window_params = [{transform_indices = @transform_0, window_bounds = array<i64: 1, 1, 512>}, {transform_indices = @transform_1, window_bounds = array<i64: 1, 1, 512>}]} {
    %c0 = arith.constant 0 : index
    %c0_0 = arith.constant 0 : index
    %c0_1 = arith.constant 0 : index
    %0 = vector.load %arg1[%c0, %c0_0, %c0_1] : memref<1x1x512xf32, #tpu.memory_space<vmem>>, vector<1x1x512xf32>
    %cst = arith.constant 5.000000e-01 : f32
    %1 = vector.broadcast %cst : f32 to vector<1x1x512xf32>
    %2 = arith.mulf %0, %1 : vector<1x1x512xf32>
    %c0_2 = arith.constant 0 : index
    %c0_3 = arith.constant 0 : index
    %c0_4 = arith.constant 0 : index
    %3 = vector.load %arg2[%c0_2, %c0_3, %c0_4] : memref<1x1x512xf32, #tpu.memory_space<vmem>>, vector<1x1x512xf32>
    tpu.vector_store %arg2[%c0_2, %c0_3, %c0_4], %2 {strides = array<i32>} : memref<1x1x512xf32, #tpu.memory_space<vmem>>, vector<1x1x512xf32>,
    return
  }
  func.func @transform_0(%arg0: i32) -> (i32, i32, i32) {
    %c0_i32 = arith.constant 0 : i32
    %c0_i32_0 = arith.constant 0 : i32
    %c0_i32_1 = arith.constant 0 : i32
    return %arg0, %c0_i32, %c0_i32_0 : i32, i32, i32
  }
  func.func @transform_1(%arg0: i32) -> (i32, i32, i32) {
    %c0_i32 = arith.constant 0 : i32
    %c0_i32_0 = arith.constant 0 : i32
    %c0_i32_1 = arith.constant 0 : i32
    return %arg0, %c0_i32, %c0_i32_0 : i32, i32, i32
  }
}

</mosaic_0001>

<bundles_post_ra>
// kernel: tpu_custom_call.1
= control target key start
LH: loop header
LB: loop body
LE: loop exit
PB: predicated region body
PF: predicated region fallthrough
CT: control target
= control target key end

     0   :  { %6 = vsyncpa [#allocation3], 0  ;;  %s534_s0 = inlined_call_operand.hbm [shape: f32[2,1,1024], index: 0, kind: input, shape index: {}]   ;;  %s535_s1 = inlined_call_operand.hbm [shape: f32[2,1,512], index: 1, kind: output, shape index: {}]  }
   0x1   :  { %8 = vsyncpa [#allocation3 + $0x1], 0 }
   0x2   :  { %9 = vsyncpa [#allocation4], 0 }
   0x3   :  { %11 = vsyncpa [#allocation4 + $0x1], 0  ;;  %s393_s6 = smov 0   ;;  %s395_s7 = smov 0  }
   0x4   :  { %s397_s8 = smov 0   ;;  %s399_s9 = smov 0  }
   0x5 LB: > { %s414_s10 = sadd.s32 4294967295, %s379_s9   ;;  %s225_s11 = sadd.s32 4294967294, %s379_s9   ;;  %s379_s9 = sphi %s399_s9, %s552_s9   ;;  %s375_s8 = sphi %s397_s8, %s551_s8   ;;  %s371_s7 = sphi %s395_s7, %s550_s7   ;;  %s367_s6 = sphi %s393_s6, %s549_s6  }
   0x6   : > { %s418_s12 = sadd.s32 1, %s379_s9   ;;  %s24_s13 = sadd.s32 1, %s375_s8 }
   0x7   : > { %s21_s14 = ssub.s32 %s379_s9, %s418_s12  ;;  %p31_p0 = scmp.ne.s32.totalorder %s375_s8, %s371_s7 }
   0x8   : > { %p22_p1 = scmp.eq.s32.totalorder %s21_s14, 0  ;;  %p32_p2 = scmp.eq.s32.totalorder %s379_s9, 0 }
   0x9   : > { %p37_p3 = scmp.ne.s32.totalorder %s371_s7, %s367_s6  ;;  %p38_p4 = scmp.eq.s32.totalorder %s414_s10, 0 }
   0xa   : > { %s430_s15 = scalar_select %p22_p1, %s375_s8, %s24_s13  }
   0xb   : > { %p432_p5 = por %p32_p2, %p31_p0  ;;  %p436_p6 = por %p38_p4, %p37_p3 }
   0xc   : > { %p61_p7 = scmp.eq.s32.totalorder %s414_s10, 1  ;;  %p67_p8 = scmp.eq.s32.totalorder %s225_s11, 1 }
   0xd   : > { %s539_s17 = scalar_select %p436_p6, 1, 0 }
   0xe   : > { %p253_p10 = scmp.lt.s32.totalorder %s379_s9, 2  ;;  %p443_p11 = por %p61_p7, %p31_p0 }
   0xf   : > { %p447_p12 = por %p67_p8, %p37_p3  ;;  %s87_s20 = sand.u32 1, %s375_s8  }
  0x10   : > { %s540_s18 = scalar_select %p443_p11, 1, 0 }
  0x11   : > { %s541_s19 = scalar_select %p447_p12, 1, 0 }
  0x12   : > { %s239_s21 = sshll.u32 %s379_s9, 7  ;;  %s228_s22 = sshll.u32 %s87_s20, 2 }
  0x13   : > { %s456_s25 = scalar_lea.hbm %s534_s0, %s239_s21  ;;  %s91_s26 = scalar_lea.vmem [#allocation2], %s228_s22 }
  0x14   : > { %s99_s27 = sshll.u32 %s91_s26, 4  ;;  %p460_p13 = pnand %p253_p10, %p432_p5  ;;  %s464_s27 = int_to_ptr.vmem [resolvable:$true] %s99_s27 }
  0x15   : > { %s88_s29 = scalar_lea.sflag [#allocation3], %s87_s20  ;;  %s287_s30 = scalar_lea.hbm %s456_s25, 64 }
  0x16   : > { %p288_p2 = scmp.ne.s32.totalorder %s456_s25, %s287_s30  ;;  %p289_p3 = pneg %p460_p13 }
  0x17   : > { %s292_s4 = scalar_lea.hbm %s534_s0, 256  ;;  %p293_p5 = scmp.lt.s32.totalorder %s456_s25, %s534_s0 }
  0x18   : > { %p290_p4 = pnand %p289_p3, %p288_p2  ;;  %p294_p8 = scmp.lt.s32.totalorder %s292_s4, %s287_s30 }
  0x1a   : > { %p291_p7 = pneg %p290_p4  ;;  %p295_p10 = por %p294_p8, %p293_p5 }
  0x1c   : > { %p296_p9 = pnand %p295_p10, %p291_p7 }
  0x1e   : > { %299 = shalt.err (!%p296_p9)
}
  0x1f   : > { %s300_s13 = scalar_lea.vmem %s464_s27, 64  ;;  %s381_s14 = smov [#allocation2]  }
  0x20   : > { %p301_p0 = scmp.ne.s32.totalorder %s464_s27, %s300_s13  ;;  %s305_s16 = sshll.u32 %s381_s14, 4  ;;  %s306_s16 = int_to_ptr.vmem [resolvable:$false] %s305_s16 }
  0x21   : > { %s307_s20 = scalar_lea.vmem %s306_s16, 128  ;;  %p308_p4 = scmp.lt.s32.totalorder %s464_s27, %s306_s16 }
  0x22   : > { %p303_p1 = pnand %p301_p0, %p289_p3  ;;  %p309_p12 = scmp.lt.s32.totalorder %s307_s20, %s300_s13 }
  0x24   : > { %p304_p2 = pneg %p303_p1  ;;  %p310_p11 = por %p309_p12, %p308_p4 }
  0x26   : > { %p311_p6 = pnand %p310_p11, %p304_p2 }
  0x28   : > { %314 = shalt.err (!%p311_p6)
}
  0x29   : > { %248 = dma.hbm_to_vmem [thread:$0]  (!%p460_p13), %s456_s25, 64, %s464_s27, %s88_s29  }
  0x2a   : > { %p543_p9 = scmp.lt.s32.totalorder %s379_s9, 3  ;;  %p544_p7 = scmp.ge.s32.totalorder %s379_s9, 1 }
  0x2c   : > { %p105_p0 = pnand %p544_p7, %p543_p9 }
  0x2d   : > { %s491_s21 = sand.u32 (!%p105_p0), 1, %s371_s7   ;;  %p545_p6 = scmp.ne.s32.totalorder (!%p105_p0), %s539_s17, 0 }
  0x2e   : > { %108 = sbr.rel (%p105_p0) target bundleno = 77 (0x4d), region = 24  ;;  %s232_s22 = sshll.u32 (!%p105_p0), %s491_s21, 2 }
  0x2f   : > { %s111_s23 = scalar_lea.sflag (!%p105_p0), [#allocation3], %s491_s21  ;;  %s114_s24 = scalar_lea.vmem (!%p105_p0), [#allocation2], %s232_s22 }
  0x33   : > { %358 = dma.done.wait (%p545_p6), %s111_s23, 64  }
  0x34   : > { %360 = vsyncadd (%p545_p6), %s111_s23, 4294967232  ;;  %v135_v0 = vlaneseq  ;;  %s132_s25 = scalar_lea.vmem [#allocation5], %s232_s22  ;;  %s240_s27 = sshll.u32 %s414_s10, 6  ;;  %v133_v1 = vld [vmem:[%s114_s24] sm:$0xf] }
  0x35   : > { %s155_s26 = sshll.u32 %s132_s25, 4  ;;  %v134_v2 = vmul.f32 0.5, %v133_v1  ;;  %s153_s30 = scalar_lea.hbm %s535_s1, %s240_s27  ;;  %s156_s26 = int_to_ptr.vmem [resolvable:$true] %s155_s26 }
  0x36   : > { %vm137_vm0 = vcmp.lt.s32.totalorder %v135_v0, 512  ;;  %s141_s2 = scalar_lea.sflag [#allocation4], %s491_s21  ;;  %s315_s3 = scalar_lea.vmem %s156_s26, 64 }
  0x37   : > { %139 = vst.msk [vmem:[%s132_s25] sm:$0xf] %vm137_vm0, %v134_v2  ;;  %p316_p11 = scmp.ne.s32.totalorder %s156_s26, %s315_s3  ;;  %p546_p12 = scmp.ne.s32.totalorder %s540_s18, 0 }
  0x38   : > { %s382_s17 = smov [#allocation5]  }
  0x39   : > { %p317_p13 = pnand %p316_p11, %p546_p12  ;;  %s319_s4 = sshll.u32 %s382_s17, 4  ;;  %s320_s4 = int_to_ptr.vmem [resolvable:$false] %s319_s4 }
  0x3a   : > { %s321_s5 = scalar_lea.vmem %s320_s4, 128  ;;  %p322_p3 = scmp.lt.s32.totalorder %s156_s26, %s320_s4 }
  0x3b   : > { %p318_p1 = pneg %p317_p13  ;;  %p323_p5 = scmp.lt.s32.totalorder %s321_s5, %s315_s3 }
  0x3d   : > { %p324_p8 = por %p323_p5, %p322_p3 }
  0x3f   : > { %p325_p10 = pnand %p324_p8, %p318_p1 }
  0x41   : > { %328 = shalt.err (!%p325_p10)
}
  0x42   : > { %s329_s10 = scalar_lea.hbm %s153_s30, 64  ;;  %s333_s14 = scalar_lea.hbm %s535_s1, 128 }
  0x43   : > { %p330_p2 = scmp.ne.s32.totalorder %s153_s30, %s329_s10  ;;  %p334_p7 = scmp.lt.s32.totalorder %s153_s30, %s535_s1 }
  0x44   : > { %p335_p0 = scmp.lt.s32.totalorder %s333_s14, %s329_s10 }
  0x45   : > { %p331_p4 = pnand %p330_p2, %p546_p12 }
  0x46   : > { %p336_p6 = por %p335_p0, %p334_p7 }
  0x47   : > { %p332_p9 = pneg %p331_p4 }
  0x49   : > { %p337_p11 = pnand %p336_p6, %p332_p9 }
  0x4b   : > { %340 = shalt.err (!%p337_p11)
}
  0x4c   : > { %243 = dma.vmem_to_hbm [thread:$0]  (%p546_p12), %s156_s26, 64, %s153_s30, %s141_s2  }
  0x4d PF: > { %s167_s21 = sand.u32 1, %s367_s6   ;;  %p547_p13 = scmp.ne.s32.totalorder %s541_s19, 0 }
  0x4e   : > { %p548_p1 = scmp.ge.s32.totalorder %s379_s9, 2  ;;  %s168_s22 = scalar_lea.sflag [#allocation4], %s167_s21 }
  0x50   : > { %p250_p3 = pnand %p548_p1, %p547_p13 }
  0x52   : > { %p251_p5 = pneg %p250_p3 }
  0x54   : > { %362 = dma.done.wait (%p251_p5), %s168_s22, 64  }
  0x55   : > { %364 = vsyncadd (%p251_p5), %s168_s22, 4294967232  ;;  %p14_p8 = scmp.ge.s32.totalorder %s418_s12, 4   ;;  %s549_s6 = smov %s371_s7 }
  0x56   : > { %s550_s7 = smov %s375_s8  ;;  %s551_s8 = smov %s430_s15 }
  0x57   : > { %s552_s9 = smov %s418_s12  ;;  %16 = sbr.rel (!%p14_p8) target bundleno = 5 (0x5), region = 69 }
  0x5c   :  { %173 = vsyncpa [#allocation3], 1 }
  0x5d   :  { %175 = vsyncpa [#allocation3 + $0x1], 1 }
  0x5e   :  { %176 = vsyncpa [#allocation4], 1 }
  0x5f   :  { %178 = vsyncpa [#allocation4 + $0x1], 1 }

</bundles_post_ra>
